<compile_context>
chip_gen: v7x
topology: tpu7x:2x2x1
jax: 0.10.0
libtpu: 0.0.40
codegen_flags: <defaults>
</compile_context>

<pallas_src>
import jax
import jax.numpy as jnp
from jax.experimental import pallas as pl
from jax.experimental.pallas import tpu as pltpu

EPS = 1e-5
LEAKY_SLOPE = 0.01  # nn.LeakyReLU default


def _decoder_kernel(r_ref, w1_ref, b1_ref, wout_ref, bout_ref, out_ref):
    """One Weibull decoder branch per grid step, fully fused:
       (Linear + folded BatchNorm) -> LeakyReLU -> fused output heads."""
    x = r_ref[0]                                                    # [N, H]

    # fc: Linear(hidden, hidden) with eval-mode BN pre-folded into w1/b1.
    h = jnp.dot(x, w1_ref[0], preferred_element_type=jnp.float32) + b1_ref[0]

    # LeakyReLU (single mul + max on the VPU).
    h = jnp.maximum(h, LEAKY_SLOPE * h)

    # Dropout: identity in eval mode.

    # Fused output heads: [logshape | logscale] in one MXU dot.
    out_ref[...] = (jnp.dot(h, wout_ref[0], preferred_element_type=jnp.float32)
                    + bout_ref[0])                                  # [N, 2*out]


def _fold_branch(p):
    """Fold eval-mode BatchNorm1d into the first Linear and fuse both heads.
    Done in f32 outside the kernel to preserve numerical tolerance."""
    s = p["gamma"] * jax.lax.rsqrt(p["var"] + EPS)                  # [1, H]
    w1 = p["w1"] * s                                                # per-output-column scale
    b1 = (p["b1"] - p["mu"]) * s + p["beta"]                        # [1, H]
    w_out = jnp.concatenate([p["w_shape"], p["w_scale"]], axis=1)   # [H, 2*out]
    b_out = jnp.concatenate([p["b_shape"], p["b_scale"]], axis=1)   # [1, 2*out]
    return w1, b1, w_out, b_out


def _run_fused(r_stacked, w1_s, b1_s, wout_s, bout_s):
    """Single pallas_call over grid=(2,) branches.  Output is one lane-dense
    [2N, 2*out] slab (rows: branch, lanes: [logshape | logscale])."""
    _, n, hidden = r_stacked.shape
    two_out = wout_s.shape[-1]

    in_specs = [
        pl.BlockSpec((1, n, hidden), lambda b: (b, 0, 0)),          # r
        pl.BlockSpec((1, hidden, hidden), lambda b: (b, 0, 0)),     # w1 (BN folded)
        pl.BlockSpec((1, 1, hidden), lambda b: (b, 0, 0)),          # b1 (BN folded)
        pl.BlockSpec((1, hidden, two_out), lambda b: (b, 0, 0)),    # w_out (heads fused)
        pl.BlockSpec((1, 1, two_out), lambda b: (b, 0, 0)),         # b_out (heads fused)
    ]
    out_specs = pl.BlockSpec((n, two_out), lambda b: (b, 0))
    out_shape = jax.ShapeDtypeStruct((2 * n, two_out), jnp.float32)

    return pl.pallas_call(
        _decoder_kernel,
        out_shape=out_shape,
        grid=(2,),
        in_specs=in_specs,
        out_specs=out_specs,
        compiler_params=pltpu.CompilerParams(
            dimension_semantics=("parallel",)),   # branches -> 2 TCs on v7x
    )(r_stacked, w1_s, b1_s, wout_s, bout_s)


def _init_branch_params(key, hidden_dim, output_dim):
    """Deterministic synthetic init (stands in for `model_init`)."""
    ks = jax.random.split(key, 8)
    scale = 0.1
    # Linear weights are created PyTorch-style (out, in) then transposed so the
    # kernel can do x @ W directly.
    w1 = scale * jax.random.normal(ks[0], (hidden_dim, hidden_dim), jnp.float32)
    w_scale = scale * jax.random.normal(ks[1], (output_dim, hidden_dim), jnp.float32)
    w_shape = scale * jax.random.normal(ks[2], (output_dim, hidden_dim), jnp.float32)
    return {
        "w1": w1.T,
        "b1": scale * jax.random.normal(ks[3], (1, hidden_dim), jnp.float32),
        "gamma": scale * jax.random.normal(ks[4], (1, hidden_dim), jnp.float32),
        "beta": scale * jax.random.normal(ks[5], (1, hidden_dim), jnp.float32),
        # BN running buffers keep their PyTorch defaults (not parameters).
        "mu": jnp.zeros((1, hidden_dim), jnp.float32),
        "var": jnp.ones((1, hidden_dim), jnp.float32),
        "w_scale": w_scale.T,
        "b_scale": scale * jax.random.normal(ks[6], (1, output_dim), jnp.float32),
        "w_shape": w_shape.T,
        "b_shape": scale * jax.random.normal(ks[7], (1, output_dim), jnp.float32),
    }


@jax.jit
def decoder_weibull_forward(r0, r1, params_zero, params_one):
    n = r0.shape[0]
    out_dim = params_zero["w_scale"].shape[1]

    # Fold BN + fuse heads (cheap one-shot XLA ops, f32), stack both branches.
    f0 = _fold_branch(params_zero)
    f1 = _fold_branch(params_one)
    w1_s, b1_s, wout_s, bout_s = (jnp.stack([a, b]) for a, b in zip(f0, f1))
    r_stacked = jnp.stack([r0, r1])                                 # [2, N, H]

    out = _run_fused(r_stacked, w1_s, b1_s, wout_s, bout_s)         # [2N, 2*out]
    out_zero, out_one = out[:n], out[n:]
    return {
        "logscale_zero": out_zero[:, out_dim:],
        "logshape_zero": out_zero[:, :out_dim],
        "logscale_one": out_one[:, out_dim:],
        "logshape_one": out_one[:, :out_dim],
    }


def _reference_branch(r, p):
    """Pure-JAX reference with explicit (un-folded) BatchNorm."""
    h = r @ p["w1"] + p["b1"]
    h = (h - p["mu"]) / jnp.sqrt(p["var"] + EPS) * p["gamma"] + p["beta"]
    h = jnp.where(h > 0, h, LEAKY_SLOPE * h)
    return h @ p["w_shape"] + p["b_shape"], h @ p["w_scale"] + p["b_scale"]


if __name__ == "__main__":
    batch, hidden_dim, output_dim = 8, 32, 16

    key = jax.random.PRNGKey(0)
    k_r0, k_r1, k_p0, k_p1 = jax.random.split(key, 4)

    r0 = jax.random.normal(k_r0, (batch, hidden_dim), jnp.float32)
    r1 = jax.random.normal(k_r1, (batch, hidden_dim), jnp.float32)

    params_zero = _init_branch_params(k_p0, hidden_dim, output_dim)
    params_one = _init_branch_params(k_p1, hidden_dim, output_dim)

    out = decoder_weibull_forward(r0, r1, params_zero, params_one)
    out = jax.block_until_ready(out)

    # lightweight correctness check against a pure-JAX (un-folded BN) reference
    ref_shape0, ref_scale0 = _reference_branch(r0, params_zero)
    ref_shape1, ref_scale1 = _reference_branch(r1, params_one)
    assert jnp.allclose(out["logshape_zero"], ref_shape0, atol=1e-4, rtol=1e-4)
    assert jnp.allclose(out["logscale_zero"], ref_scale0, atol=1e-4, rtol=1e-4)
    assert jnp.allclose(out["logshape_one"], ref_shape1, atol=1e-4, rtol=1e-4)
    assert jnp.allclose(out["logscale_one"], ref_scale1, atol=1e-4, rtol=1e-4)

    print("KERNEL_OK")
</pallas_src>

<mosaic_0001>
module attributes {stable_mosaic.version = 11 : i64} {
  func.func @_decoder_kernel(%arg0: i32, %arg1: memref<1x8x32xf32, #tpu.memory_space<vmem>>, %arg2: memref<1x32x32xf32, #tpu.memory_space<vmem>>, %arg3: memref<1x1x32xf32, #tpu.memory_space<vmem>>, %arg4: memref<1x32x32xf32, #tpu.memory_space<vmem>>, %arg5: memref<1x1x32xf32, #tpu.memory_space<vmem>>, %arg6: memref<8x32xf32, #tpu.memory_space<vmem>>) attributes {dimension_semantics = [#tpu.dimension_semantics<parallel>], iteration_bounds = array<i64: 2>, scalar_prefetch = 0 : i64, scratch_operands = 0 : i64, tpu.core_type = #tpu.core_type<tc>, window_params = [{transform_indices = @transform_0, window_bounds = array<i64: 1, 8, 32>}, {transform_indices = @transform_1, window_bounds = array<i64: 1, 32, 32>}, {transform_indices = @transform_2, window_bounds = array<i64: 1, 1, 32>}, {transform_indices = @transform_3, window_bounds = array<i64: 1, 32, 32>}, {transform_indices = @transform_4, window_bounds = array<i64: 1, 1, 32>}, {transform_indices = @transform_5, window_bounds = array<i64: 8, 32>}]} {
    %c0 = arith.constant 0 : index
    %c0_0 = arith.constant 0 : index
    %c0_1 = arith.constant 0 : index
    %0 = vector.load %arg1[%c0, %c0_0, %c0_1] : memref<1x8x32xf32, #tpu.memory_space<vmem>>, vector<1x8x32xf32>
    %1 = vector.shape_cast %0 : vector<1x8x32xf32> to vector<8x32xf32>
    %c0_2 = arith.constant 0 : index
    %c0_3 = arith.constant 0 : index
    %c0_4 = arith.constant 0 : index
    %2 = vector.load %arg2[%c0_2, %c0_3, %c0_4] : memref<1x32x32xf32, #tpu.memory_space<vmem>>, vector<1x32x32xf32>
    %3 = vector.shape_cast %2 : vector<1x32x32xf32> to vector<32x32xf32>
    %cst = arith.constant dense<0.000000e+00> : vector<8x32xf32>
    %4 = tpu.matmul %1, %3, %cst {dimension_numbers = #tpu.dot_dimension_numbers<[1], [0], [0], [1], [0, 0, 1, 1], [], []>} : vector<8x32xf32>, vector<32x32xf32>, vector<8x32xf32> -> vector<8x32xf32>
    %c0_5 = arith.constant 0 : index
    %c0_6 = arith.constant 0 : index
    %c0_7 = arith.constant 0 : index
    %5 = vector.load %arg3[%c0_5, %c0_6, %c0_7] : memref<1x1x32xf32, #tpu.memory_space<vmem>>, vector<1x1x32xf32>
    %6 = vector.shape_cast %5 : vector<1x1x32xf32> to vector<1x32xf32>
    %7 = vector.broadcast %6 : vector<1x32xf32> to vector<8x32xf32>
    %8 = arith.addf %4, %7 : vector<8x32xf32>
    %cst_8 = arith.constant 0.00999999977 : f32
    %9 = vector.broadcast %cst_8 : f32 to vector<8x32xf32>
    %10 = arith.mulf %9, %8 : vector<8x32xf32>
    %11 = arith.maximumf %8, %10 : vector<8x32xf32>
    %c0_9 = arith.constant 0 : index
    %c0_10 = arith.constant 0 : index
    %c0_11 = arith.constant 0 : index
    %12 = vector.load %arg4[%c0_9, %c0_10, %c0_11] : memref<1x32x32xf32, #tpu.memory_space<vmem>>, vector<1x32x32xf32>
    %13 = vector.shape_cast %12 : vector<1x32x32xf32> to vector<32x32xf32>
    %cst_12 = arith.constant dense<0.000000e+00> : vector<8x32xf32>
    %14 = tpu.matmul %11, %13, %cst_12 {dimension_numbers = #tpu.dot_dimension_numbers<[1], [0], [0], [1], [0, 0, 1, 1], [], []>} : vector<8x32xf32>, vector<32x32xf32>, vector<8x32xf32> -> vector<8x32xf32>
    %c0_13 = arith.constant 0 : index
    %c0_14 = arith.constant 0 : index
    %c0_15 = arith.constant 0 : index
    %15 = vector.load %arg5[%c0_13, %c0_14, %c0_15] : memref<1x1x32xf32, #tpu.memory_space<vmem>>, vector<1x1x32xf32>
    %16 = vector.shape_cast %15 : vector<1x1x32xf32> to vector<1x32xf32>
    %17 = vector.broadcast %16 : vector<1x32xf32> to vector<8x32xf32>
    %18 = arith.addf %14, %17 : vector<8x32xf32>
    %c0_16 = arith.constant 0 : index
    %c0_17 = arith.constant 0 : index
    %19 = vector.load %arg6[%c0_16, %c0_17] : memref<8x32xf32, #tpu.memory_space<vmem>>, vector<8x32xf32>
    tpu.vector_store %arg6[%c0_16, %c0_17], %18 {strides = array<i32>} : memref<8x32xf32, #tpu.memory_space<vmem>>, vector<8x32xf32>,
    return
  }
  func.func @transform_0(%arg0: i32) -> (i32, i32, i32) {
    %c0_i32 = arith.constant 0 : i32
    %c0_i32_0 = arith.constant 0 : i32
    %c0_i32_1 = arith.constant 0 : i32
    return %arg0, %c0_i32, %c0_i32_0 : i32, i32, i32
  }
  func.func @transform_1(%arg0: i32) -> (i32, i32, i32) {
    %c0_i32 = arith.constant 0 : i32
    %c0_i32_0 = arith.constant 0 : i32
    %c0_i32_1 = arith.constant 0 : i32
    return %arg0, %c0_i32, %c0_i32_0 : i32, i32, i32
  }
  func.func @transform_2(%arg0: i32) -> (i32, i32, i32) {
    %c0_i32 = arith.constant 0 : i32
    %c0_i32_0 = arith.constant 0 : i32
    %c0_i32_1 = arith.constant 0 : i32
    return %arg0, %c0_i32, %c0_i32_0 : i32, i32, i32
  }
  func.func @transform_3(%arg0: i32) -> (i32, i32, i32) {
    %c0_i32 = arith.constant 0 : i32
    %c0_i32_0 = arith.constant 0 : i32
    %c0_i32_1 = arith.constant 0 : i32
    return %arg0, %c0_i32, %c0_i32_0 : i32, i32, i32
  }
  func.func @transform_4(%arg0: i32) -> (i32, i32, i32) {
    %c0_i32 = arith.constant 0 : i32
    %c0_i32_0 = arith.constant 0 : i32
    %c0_i32_1 = arith.constant 0 : i32
    return %arg0, %c0_i32, %c0_i32_0 : i32, i32, i32
  }
  func.func @transform_5(%arg0: i32) -> (i32, i32) {
    %c0_i32 = arith.constant 0 : i32
    %c0_i32_0 = arith.constant 0 : i32
    return %arg0, %c0_i32 : i32, i32
  }
}

</mosaic_0001>

<bundles_post_ra>
// kernel: decoder_weibull_forward.1
= control target key start
LH: loop header
LB: loop body
LE: loop exit
PB: predicated region body
PF: predicated region fallthrough
CT: control target
= control target key end

     0   :  { %s671_s18 = smov 0   ;;  %s713_s0 = inlined_call_operand.vmem [shape: f32[2,8,32], index: 0, kind: input, shape index: {}]   ;;  %s714_s1 = inlined_call_operand.vmem [shape: f32[2,32,32], index: 1, kind: input, shape index: {}]   ;;  %s715_s2 = inlined_call_operand.vmem [shape: f32[2,1,32], index: 2, kind: input, shape index: {}]   ;;  %s716_s3 = inlined_call_operand.vmem [shape: f32[2,32,32], index: 3, kind: input, shape index: {}]   ;;  %s717_s4 = inlined_call_operand.vmem [shape: f32[2,1,32], index: 4, kind: input, shape index: {}]   ;;  %s718_s5 = inlined_call_operand.vmem [shape: f32[16,32], index: 5, kind: output, shape index: {}]  }
   0x1 LB: > { %s556_s19 = sadd.s32 4294967295, %s636_s18   ;;  %p560_p0 = scmp.ge.s32.totalorder %s636_s18, 1  ;;  %s636_s18 = sphi %s671_s18, %s15_s18  }
   0x2   : > { %p222_p1 = scmp.lt.s32.totalorder %s636_s18, 3 }
   0x4   : > { %p223_p2 = pnand %p560_p0, %p222_p1 }
   0x5   : > { %p264_p3 = scmp.lt.s32.totalorder (!%p223_p2), %s556_s19, 1  ;;  %v638_v0 = vmov (!%p223_p2), 0.0|0.0   ;;  %vm639_vm0 = vmmov (!%p223_p2), 0   ;;  %v640_v1 = vmov (!%p223_p2), 0.0   ;;  %vm300_vm1 = vcmask (!%p223_p2), 261120  }
   0x6   : > { %226 = sbr.rel (%p223_p2) target bundleno = 459 (0x1cb), region = 40  ;;  %607 = vmatprep.subr.bf16.mxu0 (!%p223_p2), %v638_v0  ;;  %593 = vmatprep.mubr.msk.f32.mxu0 (!%p223_p2), %vm639_vm0, %v640_v1 }
   0x7   : > { %613 = vmatprep.subr.bf16.mxu1 (!%p223_p2), %v638_v0  ;;  %604 = vmatprep.mubr.msk.f32.mxu1 (!%p223_p2), %vm639_vm0, %v640_v1 }
   0xd   : > { %s720_s19 = smov (!%p264_p3, %s556_s19), 1 }
   0xe   : > { %s573_s20 = sshll.u32 %s720_s19, 5  ;;  %s561_s24 = sshll.u32 %s720_s19, 3 }
   0xf   : > { %s272_s23 = scalar_lea.vmem %s714_s1, %s573_s20  ;;  %s267_s27 = scalar_lea.vmem %s713_s0, %s561_s24 }
  0x10   : > { %v289_v2 = vld [vmem:[%s272_s23] sm:$0xff]  ;;  %v290_v3 = vld [vmem:[%s272_s23 + $0x8] sm:$0xff]  ;;  %v291_v4 = vld [vmem:[%s272_s23 + $0x10] sm:$0xff]  ;;  %s280_s30 = scalar_lea.vmem %s716_s3, %s573_s20  ;;  %s275_s8 = scalar_lea.vmem %s715_s2, %s720_s19 }
  0x11   : > { %v608_v5 = vpack.c.bf16 %v290_v3, %v289_v2  ;;  %v292_v6 = vld [vmem:[%s272_s23 + $0x18] sm:$0xff]  ;;  %v288_v8 = vld [vmem:[%s267_s27] sm:$0xff]  ;;  %v377_v10 = vld [vmem:[%s280_s30 + $0x8] sm:$0xff]  ;;  %s283_s11 = scalar_lea.vmem %s717_s4, %s720_s19  ;;  %s287_s14 = scalar_lea.vmem %s718_s5, %s561_s24 }
  0x12   : > { %v611_v7 = vpack.c.bf16 %v292_v6, %v291_v4  ;;  %v376_v9 = vld [vmem:[%s280_s30] sm:$0xff]  ;;  %v378_v12 = vld [vmem:[%s280_s30 + $0x10] sm:$0xff]  ;;  %v379_v13 = vld [vmem:[%s280_s30 + $0x18] sm:$0xff] }
  0x13   : > { %609 = vmatpush3.bf16.msra.mxu0 %v608_v5  ;;  %v614_v11 = vpack.c.bf16 %v377_v10, %v376_v9  ;;  %v617_v14 = vpack.c.bf16 %v379_v13, %v378_v12  ;;  %v567_v15 = vld [vmem:[%s275_s8] ss:$0 sm:$0xff] }
  0x14   : > { %610 = vmatprep.subr.bf16.mxu0 %v638_v0  ;;  %v569_v21 = vld [vmem:[%s283_s11] ss:$0 sm:$0xff] }
  0x15   : > { %615 = vmatpush3.bf16.msra.mxu1 %v614_v11 }
  0x16   : > { %616 = vmatprep.subr.bf16.mxu1 %v638_v0 }
  0x17   : > { %612 = vmatpush3.bf16.msra.mxu0 %v611_v7 }
  0x19   : > { %618 = vmatpush3.bf16.msra.mxu1 %v617_v14 }
  0x1a   : > { %594 = vmatmul.mubr.msk.f32.vlgmr.msra.gmra.mrb[0].mxu0 %vm300_vm1, %v288_v8 }
  0xed   : > { %v370_v16 = vpop.f32.mrb[0].mxu0 }
  0xee   : > { %v371_v17 = vadd.f32 %v567_v15, %v370_v16  ;;  %v595_v18 = vpop.f32.mrb[1].mxu0 }
  0xf0   : > { %v374_v19 = vmul.f32 0.01, %v371_v17 }
  0xf2   : > { %v375_v20 = vmax.f32 %v371_v17, %v374_v19 }
  0xf4   : > { %605 = vmatmul.mubr.msk.f32.vlgmr.msra.gmra.mrb[0].mxu1 %vm300_vm1, %v375_v20 }
 0x1c7   : > { %v456_v22 = vpop.f32.mrb[0].mxu1 }
 0x1c8   : > { %v457_v23 = vadd.f32 %v569_v21, %v456_v22  ;;  %v606_v24 = vpop.f32.mrb[1].mxu1 }
 0x1ca   : > { %460 = vst.msk [vmem:[%s287_s14] sm:$0xff] %vm300_vm1, %v457_v23 }
 0x1cb PF: > { %s15_s18 = sadd.s32 1, %s636_s18  }
 0x1cc   : > { %p12_p4 = scmp.ge.s32.totalorder %s15_s18, 4  }
 0x1ce   :  { %14 = sbr.rel (!%p12_p4) target bundleno = 1 (0x1), region = 82 }

</bundles_post_ra>
